<compile_context>
chip_gen: v5e
topology: v5e:2x2
jax: 0.10.0
libtpu: 0.0.40
codegen_flags: <defaults>
</compile_context>

<pallas_src>
import jax
import jax.numpy as jnp
from jax.experimental import pallas as pl
from jax.experimental.pallas import tpu as pltpu


# --------------------------------------------------------------------------
# In-kernel elementwise helpers (f32 VPU/EUP math)
# --------------------------------------------------------------------------
def _mish(v):
    # mish(v) = v * tanh(softplus(v)) = v * t / (t + 2),  t = e*(e+2), e = exp(v)
    # One EUP exp + one approx reciprocal (vs. exp + log1p + tanh before).
    e = jnp.exp(jnp.minimum(v, 20.0))      # clamp: mish(v) ~= v for v > 20 anyway
    t = e * (e + 2.0)
    return v * t * pl.reciprocal(t + 2.0, approx=True)


def _sigmoid(v):
    # Overflow-safe sigmoid with one exp + one approx reciprocal.
    e = jnp.exp(-jnp.abs(v))
    r = pl.reciprocal(1.0 + e, approx=True)
    return jnp.where(v >= 0.0, r, e * r)


# --------------------------------------------------------------------------
# Kernel
# --------------------------------------------------------------------------
def dnn_prob_kernel(x_ref, w1_ref, ws_ref, pb_ref, out_ref):
    f32 = jnp.float32
    bf16 = jnp.bfloat16

    x = x_ref[...]                                                   # (TB, 26) f32

    # --- fc_reconstruct ----------------------------------------------------
    # Linear(26 -> 128) + Mish           (Dropout -> identity, eval mode)
    h = jnp.dot(x, w1_ref[...], preferred_element_type=f32) + pb_ref[0:1, :]
    h = _mish(h)
    # Linear(128 -> 64) + ReLU           (padded to width 128; pads stay 0)
    h = jnp.dot(h.astype(bf16), ws_ref[0], preferred_element_type=f32) + pb_ref[1:2, :]
    h = jnp.maximum(h, 0.0)
    # Linear(64 -> 32) + ReLU            (Dropout -> identity)
    h = jnp.dot(h.astype(bf16), ws_ref[1], preferred_element_type=f32) + pb_ref[2:3, :]
    h = jnp.maximum(h, 0.0)
    # Linear(32 -> 26) + Mish -> feature (Dropout -> identity)
    h = jnp.dot(h.astype(bf16), ws_ref[2], preferred_element_type=f32) + pb_ref[3:4, :]
    feat = _mish(h)

    # --- classifier ----------------------------------------------------------
    # Linear(26 -> 16) + Mish            (Dropout -> identity)
    c = jnp.dot(feat.astype(bf16), ws_ref[3], preferred_element_type=f32) + pb_ref[4:5, :]
    c = _mish(c)
    # Linear(16 -> 1): VPU multiply + lane reduce instead of an N=1 MXU matmul.
    logit = jnp.sum(c * pb_ref[6:7, :], axis=-1, keepdims=True) + pb_ref[5:6, 0:1]

    # sigmoid
    out_ref[...] = _sigmoid(logit).astype(out_ref.dtype)


# --------------------------------------------------------------------------
# Parameter plumbing
# --------------------------------------------------------------------------
def init_params(key, n_feature=26, dtype=jnp.float32):
    """Deterministic synthetic parameters. Weights are (in, out); biases (1, out)."""
    dims = [
        (n_feature, 128),  # fc_reconstruct Linear 1
        (128, 64),         # Linear 2
        (64, 32),          # Linear 3
        (32, n_feature),   # Linear 4
        (n_feature, 16),   # classifier Linear 1
        (16, 1),           # classifier Linear 2
    ]
    params = []
    for (fan_in, fan_out) in dims:
        key, kw, kb = jax.random.split(key, 3)
        scale = 1.0 / jnp.sqrt(jnp.float32(fan_in))
        w = jax.random.uniform(kw, (fan_in, fan_out), dtype, -1.0, 1.0) * scale
        b = jax.random.uniform(kb, (1, fan_out), dtype, -1.0, 1.0) * scale
        params += [w, b]
    return params


def pack_params(params):
    """Pack the 12 (in,out)-layout f32 params into the 3 kernel inputs."""
    (w1, b1, w2, b2, w3, b3, w4, b4, wc1, bc1, wc2, bc2) = params
    W = 128

    def pad_w(w):
        ki, ko = w.shape
        return jnp.pad(w, ((0, W - ki), (0, W - ko))).astype(jnp.bfloat16)

    def pad_row(b):
        b = b.reshape(-1).astype(jnp.float32)
        return jnp.pad(b, (0, W - b.shape[0]))

    w_stack = jnp.stack([pad_w(w2), pad_w(w3), pad_w(w4), pad_w(wc1)])
    pb = jnp.stack([
        pad_row(b1), pad_row(b2), pad_row(b3), pad_row(b4),
        pad_row(bc1), pad_row(bc2),
        pad_row(wc2),                       # (16,1) -> 16-lane row, zero-padded
        jnp.zeros((W,), jnp.float32),
    ])
    return w1.astype(jnp.float32), w_stack, pb


def _round_up(n, m):
    return ((n + m - 1) // m) * m


# --------------------------------------------------------------------------
# Wrapper
# --------------------------------------------------------------------------
def dnn_model_prob(x, params, *, tile_b=2048):
    """Forward pass. x: (B, n_feature) f32 -> (B, 1) f32 probabilities.

    tile_b: batch tile per grid step.  2048 is safe under the 32 MiB scoped
    VMEM default on all chips; v6e (128 MiB VMEM) can go larger, keep <= ~4096
    on v7x (64 MiB VMEM).
    """
    B, F = x.shape
    w1, w_stack, pb = pack_params(params)

    tb = min(tile_b, _round_up(B, 8))
    bp = _round_up(B, tb)
    if bp != B:
        x = jnp.pad(x, ((0, bp - B), (0, 0)))
    grid = (bp // tb,)

    out = pl.pallas_call(
        dnn_prob_kernel,
        out_shape=jax.ShapeDtypeStruct((bp, 1), jnp.float32),
        grid=grid,
        in_specs=[
            pl.BlockSpec((tb, F), lambda i: (i, 0)),           # x tile (streamed)
            pl.BlockSpec((F, 128), lambda i: (0, 0)),          # w1 (resident)
            pl.BlockSpec((4, 128, 128), lambda i: (0, 0, 0)),  # w_stack (resident)
            pl.BlockSpec((8, 128), lambda i: (0, 0)),          # pb (resident)
        ],
        out_specs=pl.BlockSpec((tb, 1), lambda i: (i, 0)),
        compiler_params=pltpu.CompilerParams(
            dimension_semantics=("parallel",)),
    )(x, w1, w_stack, pb)
    return out[:B]


# --------------------------------------------------------------------------
# Pure-JAX reference (mirrors the kernel's mixed-precision policy; exact
# mish/sigmoid so the only deltas are approx reciprocal + accumulation order)
# --------------------------------------------------------------------------
def dnn_model_prob_ref(x, params):
    w1, b1, w2, b2, w3, b3, w4, b4, wc1, bc1, wc2, bc2 = params

    def mish(v):
        sp = jnp.maximum(v, 0.0) + jnp.log1p(jnp.exp(-jnp.abs(v)))
        return v * jnp.tanh(sp)

    def lin_bf16(h, w, b):
        return jnp.dot(h.astype(jnp.bfloat16), w.astype(jnp.bfloat16),
                       preferred_element_type=jnp.float32) + b

    h = mish(jnp.dot(x, w1, preferred_element_type=jnp.float32) + b1)  # f32 layer 1
    h = jnp.maximum(lin_bf16(h, w2, b2), 0.0)
    h = jnp.maximum(lin_bf16(h, w3, b3), 0.0)
    feature = mish(lin_bf16(h, w4, b4))
    c = mish(lin_bf16(feature, wc1, bc1))
    logit = jnp.dot(c, wc2, preferred_element_type=jnp.float32) + bc2  # f32 tail
    return jax.nn.sigmoid(logit)


if __name__ == "__main__":
    n_feature = 26
    batch = 8

    key = jax.random.PRNGKey(0)
    key, kx = jax.random.split(key)
    x = jax.random.normal(kx, (batch, n_feature), dtype=jnp.float32)
    params = init_params(key, n_feature=n_feature)

    prob = jax.block_until_ready(dnn_model_prob(x, params))
    ref = jax.block_until_ready(dnn_model_prob_ref(x, params))

    assert prob.shape == (batch, 1), prob.shape
    assert bool(jnp.all((prob >= 0.0) & (prob <= 1.0)))
    assert jnp.allclose(prob, ref, atol=5e-3, rtol=5e-3), (prob, ref)
    print("KERNEL_OK")
</pallas_src>

<mosaic_0001>
module attributes {stable_mosaic.version = 11 : i64} {
  func.func @dnn_prob_kernel(%arg0: i32, %arg1: memref<8x26xf32, #tpu.memory_space<vmem>>, %arg2: memref<26x128xf32, #tpu.memory_space<vmem>>, %arg3: memref<4x128x128xbf16, #tpu.memory_space<vmem>>, %arg4: memref<8x128xf32, #tpu.memory_space<vmem>>, %arg5: memref<8x1xf32, #tpu.memory_space<vmem>>) attributes {dimension_semantics = [#tpu.dimension_semantics<parallel>], iteration_bounds = array<i64: 1>, scalar_prefetch = 0 : i64, scratch_operands = 0 : i64, tpu.core_type = #tpu.core_type<tc>, window_params = [{transform_indices = @transform_0, window_bounds = array<i64: 8, 26>}, {pipeline_mode = #tpu.pipeline_mode<synchronous>, transform_indices = @transform_1, window_bounds = array<i64: 26, 128>}, {pipeline_mode = #tpu.pipeline_mode<synchronous>, transform_indices = @transform_2, window_bounds = array<i64: 4, 128, 128>}, {pipeline_mode = #tpu.pipeline_mode<synchronous>, transform_indices = @transform_3, window_bounds = array<i64: 8, 128>}, {transform_indices = @transform_4, window_bounds = array<i64: 8, 1>}]} {
    %c0 = arith.constant 0 : index
    %c0_0 = arith.constant 0 : index
    %0 = vector.load %arg1[%c0, %c0_0] : memref<8x26xf32, #tpu.memory_space<vmem>>, vector<8x26xf32>
    %c0_1 = arith.constant 0 : index
    %c0_2 = arith.constant 0 : index
    %1 = vector.load %arg2[%c0_1, %c0_2] : memref<26x128xf32, #tpu.memory_space<vmem>>, vector<26x128xf32>
    %cst = arith.constant dense<0.000000e+00> : vector<8x128xf32>
    %2 = tpu.matmul %0, %1, %cst {dimension_numbers = #tpu.dot_dimension_numbers<[1], [0], [0], [1], [0, 0, 1, 1], [], []>} : vector<8x26xf32>, vector<26x128xf32>, vector<8x128xf32> -> vector<8x128xf32>
    %c0_3 = arith.constant 0 : index
    %c0_4 = arith.constant 0 : index
    %3 = vector.load %arg4[%c0_3, %c0_4] : memref<8x128xf32, #tpu.memory_space<vmem>>, vector<1x128xf32>
    %4 = vector.broadcast %3 : vector<1x128xf32> to vector<8x128xf32>
    %5 = arith.addf %2, %4 : vector<8x128xf32>
    %cst_5 = arith.constant 2.000000e+01 : f32
    %6 = vector.broadcast %cst_5 : f32 to vector<8x128xf32>
    %7 = arith.minimumf %5, %6 : vector<8x128xf32>
    %8 = math.exp %7 : vector<8x128xf32>
    %cst_6 = arith.constant 2.000000e+00 : f32
    %9 = vector.broadcast %cst_6 : f32 to vector<8x128xf32>
    %10 = arith.addf %8, %9 : vector<8x128xf32>
    %11 = arith.mulf %8, %10 : vector<8x128xf32>
    %12 = arith.mulf %5, %11 : vector<8x128xf32>
    %cst_7 = arith.constant 2.000000e+00 : f32
    %13 = vector.broadcast %cst_7 : f32 to vector<8x128xf32>
    %14 = arith.addf %11, %13 : vector<8x128xf32>
    %15 = tpu.reciprocal %14 {approx = true} : vector<8x128xf32> -> vector<8x128xf32>
    %16 = arith.mulf %12, %15 : vector<8x128xf32>
    %17 = arith.truncf %16 : vector<8x128xf32> to vector<8x128xbf16>
    %c0_8 = arith.constant 0 : index
    %c0_9 = arith.constant 0 : index
    %c0_10 = arith.constant 0 : index
    %18 = vector.load %arg3[%c0_8, %c0_9, %c0_10] : memref<4x128x128xbf16, #tpu.memory_space<vmem>>, vector<1x128x128xbf16>
    %19 = vector.shape_cast %18 : vector<1x128x128xbf16> to vector<128x128xbf16>
    %cst_11 = arith.constant dense<0.000000e+00> : vector<8x128xf32>
    %20 = tpu.matmul %17, %19, %cst_11 {dimension_numbers = #tpu.dot_dimension_numbers<[1], [0], [0], [1], [0, 0, 1, 1], [], []>} : vector<8x128xbf16>, vector<128x128xbf16>, vector<8x128xf32> -> vector<8x128xf32>
    %c1 = arith.constant 1 : index
    %c0_12 = arith.constant 0 : index
    %21 = vector.load %arg4[%c1, %c0_12] : memref<8x128xf32, #tpu.memory_space<vmem>>, vector<1x128xf32>
    %22 = vector.broadcast %21 : vector<1x128xf32> to vector<8x128xf32>
    %23 = arith.addf %20, %22 : vector<8x128xf32>
    %cst_13 = arith.constant 0.000000e+00 : f32
    %24 = vector.broadcast %cst_13 : f32 to vector<8x128xf32>
    %25 = arith.maximumf %23, %24 : vector<8x128xf32>
    %26 = arith.truncf %25 : vector<8x128xf32> to vector<8x128xbf16>
    %c1_14 = arith.constant 1 : index
    %c0_15 = arith.constant 0 : index
    %c0_16 = arith.constant 0 : index
    %27 = vector.load %arg3[%c1_14, %c0_15, %c0_16] : memref<4x128x128xbf16, #tpu.memory_space<vmem>>, vector<1x128x128xbf16>
    %28 = vector.shape_cast %27 : vector<1x128x128xbf16> to vector<128x128xbf16>
    %cst_17 = arith.constant dense<0.000000e+00> : vector<8x128xf32>
    %29 = tpu.matmul %26, %28, %cst_17 {dimension_numbers = #tpu.dot_dimension_numbers<[1], [0], [0], [1], [0, 0, 1, 1], [], []>} : vector<8x128xbf16>, vector<128x128xbf16>, vector<8x128xf32> -> vector<8x128xf32>
    %c2 = arith.constant 2 : index
    %c0_18 = arith.constant 0 : index
    %30 = vector.load %arg4[%c2, %c0_18] : memref<8x128xf32, #tpu.memory_space<vmem>>, vector<1x128xf32>
    %31 = vector.broadcast %30 : vector<1x128xf32> to vector<8x128xf32>
    %32 = arith.addf %29, %31 : vector<8x128xf32>
    %cst_19 = arith.constant 0.000000e+00 : f32
    %33 = vector.broadcast %cst_19 : f32 to vector<8x128xf32>
    %34 = arith.maximumf %32, %33 : vector<8x128xf32>
    %35 = arith.truncf %34 : vector<8x128xf32> to vector<8x128xbf16>
    %c2_20 = arith.constant 2 : index
    %c0_21 = arith.constant 0 : index
    %c0_22 = arith.constant 0 : index
    %36 = vector.load %arg3[%c2_20, %c0_21, %c0_22] : memref<4x128x128xbf16, #tpu.memory_space<vmem>>, vector<1x128x128xbf16>
    %37 = vector.shape_cast %36 : vector<1x128x128xbf16> to vector<128x128xbf16>
    %cst_23 = arith.constant dense<0.000000e+00> : vector<8x128xf32>
    %38 = tpu.matmul %35, %37, %cst_23 {dimension_numbers = #tpu.dot_dimension_numbers<[1], [0], [0], [1], [0, 0, 1, 1], [], []>} : vector<8x128xbf16>, vector<128x128xbf16>, vector<8x128xf32> -> vector<8x128xf32>
    %c3 = arith.constant 3 : index
    %c0_24 = arith.constant 0 : index
    %39 = vector.load %arg4[%c3, %c0_24] : memref<8x128xf32, #tpu.memory_space<vmem>>, vector<1x128xf32>
    %40 = vector.broadcast %39 : vector<1x128xf32> to vector<8x128xf32>
    %41 = arith.addf %38, %40 : vector<8x128xf32>
    %cst_25 = arith.constant 2.000000e+01 : f32
    %42 = vector.broadcast %cst_25 : f32 to vector<8x128xf32>
    %43 = arith.minimumf %41, %42 : vector<8x128xf32>
    %44 = math.exp %43 : vector<8x128xf32>
    %cst_26 = arith.constant 2.000000e+00 : f32
    %45 = vector.broadcast %cst_26 : f32 to vector<8x128xf32>
    %46 = arith.addf %44, %45 : vector<8x128xf32>
    %47 = arith.mulf %44, %46 : vector<8x128xf32>
    %48 = arith.mulf %41, %47 : vector<8x128xf32>
    %cst_27 = arith.constant 2.000000e+00 : f32
    %49 = vector.broadcast %cst_27 : f32 to vector<8x128xf32>
    %50 = arith.addf %47, %49 : vector<8x128xf32>
    %51 = tpu.reciprocal %50 {approx = true} : vector<8x128xf32> -> vector<8x128xf32>
    %52 = arith.mulf %48, %51 : vector<8x128xf32>
    %53 = arith.truncf %52 : vector<8x128xf32> to vector<8x128xbf16>
    %c3_28 = arith.constant 3 : index
    %c0_29 = arith.constant 0 : index
    %c0_30 = arith.constant 0 : index
    %54 = vector.load %arg3[%c3_28, %c0_29, %c0_30] : memref<4x128x128xbf16, #tpu.memory_space<vmem>>, vector<1x128x128xbf16>
    %55 = vector.shape_cast %54 : vector<1x128x128xbf16> to vector<128x128xbf16>
    %cst_31 = arith.constant dense<0.000000e+00> : vector<8x128xf32>
    %56 = tpu.matmul %53, %55, %cst_31 {dimension_numbers = #tpu.dot_dimension_numbers<[1], [0], [0], [1], [0, 0, 1, 1], [], []>} : vector<8x128xbf16>, vector<128x128xbf16>, vector<8x128xf32> -> vector<8x128xf32>
    %c4 = arith.constant 4 : index
    %c0_32 = arith.constant 0 : index
    %57 = vector.load %arg4[%c4, %c0_32] : memref<8x128xf32, #tpu.memory_space<vmem>>, vector<1x128xf32>
    %58 = vector.broadcast %57 : vector<1x128xf32> to vector<8x128xf32>
    %59 = arith.addf %56, %58 : vector<8x128xf32>
    %cst_33 = arith.constant 2.000000e+01 : f32
    %60 = vector.broadcast %cst_33 : f32 to vector<8x128xf32>
    %61 = arith.minimumf %59, %60 : vector<8x128xf32>
    %62 = math.exp %61 : vector<8x128xf32>
    %cst_34 = arith.constant 2.000000e+00 : f32
    %63 = vector.broadcast %cst_34 : f32 to vector<8x128xf32>
    %64 = arith.addf %62, %63 : vector<8x128xf32>
    %65 = arith.mulf %62, %64 : vector<8x128xf32>
    %66 = arith.mulf %59, %65 : vector<8x128xf32>
    %cst_35 = arith.constant 2.000000e+00 : f32
    %67 = vector.broadcast %cst_35 : f32 to vector<8x128xf32>
    %68 = arith.addf %65, %67 : vector<8x128xf32>
    %69 = tpu.reciprocal %68 {approx = true} : vector<8x128xf32> -> vector<8x128xf32>
    %70 = arith.mulf %66, %69 : vector<8x128xf32>
    %c6 = arith.constant 6 : index
    %c0_36 = arith.constant 0 : index
    %71 = vector.load %arg4[%c6, %c0_36] : memref<8x128xf32, #tpu.memory_space<vmem>>, vector<1x128xf32>
    %72 = vector.broadcast %71 : vector<1x128xf32> to vector<8x128xf32>
    %73 = arith.mulf %70, %72 : vector<8x128xf32>
    %cst_37 = arith.constant dense<0.000000e+00> : vector<8xf32>
    %74 = vector.multi_reduction <add>, %73, %cst_37 [1] : vector<8x128xf32> to vector<8xf32>
    %75 = vector.shape_cast %74 : vector<8xf32> to vector<8x1xf32>
    %c5 = arith.constant 5 : index
    %c0_38 = arith.constant 0 : index
    %76 = vector.load %arg4[%c5, %c0_38] : memref<8x128xf32, #tpu.memory_space<vmem>>, vector<1x1xf32>
    %77 = vector.broadcast %76 : vector<1x1xf32> to vector<8x1xf32>
    %78 = arith.addf %75, %77 : vector<8x1xf32>
    %79 = math.absf %78 : vector<8x1xf32>
    %cst_39 = arith.constant 0.000000e+00 : f32
    %80 = vector.broadcast %cst_39 : f32 to vector<8x1xf32>
    %81 = arith.subf %80, %79 : vector<8x1xf32>
    %82 = math.exp %81 : vector<8x1xf32>
    %cst_40 = arith.constant 1.000000e+00 : f32
    %83 = vector.broadcast %cst_40 : f32 to vector<8x1xf32>
    %84 = arith.addf %83, %82 : vector<8x1xf32>
    %85 = tpu.reciprocal %84 {approx = true} : vector<8x1xf32> -> vector<8x1xf32>
    %cst_41 = arith.constant 0.000000e+00 : f32
    %86 = vector.broadcast %cst_41 : f32 to vector<8x1xf32>
    %87 = arith.cmpf oge, %78, %86 : vector<8x1xf32>
    %88 = arith.mulf %82, %85 : vector<8x1xf32>
    %89 = arith.select %87, %85, %88 : vector<8x1xi1>, vector<8x1xf32>
    %c0_42 = arith.constant 0 : index
    %c0_43 = arith.constant 0 : index
    %90 = vector.load %arg5[%c0_42, %c0_43] : memref<8x1xf32, #tpu.memory_space<vmem>>, vector<8x1xf32>
    tpu.vector_store %arg5[%c0_42, %c0_43], %89 {strides = array<i32>} : memref<8x1xf32, #tpu.memory_space<vmem>>, vector<8x1xf32>,
    return
  }
  func.func @transform_0(%arg0: i32) -> (i32, i32) {
    %c0_i32 = arith.constant 0 : i32
    %c0_i32_0 = arith.constant 0 : i32
    return %arg0, %c0_i32 : i32, i32
  }
  func.func @transform_1(%arg0: i32) -> (i32, i32) {
    %c0_i32 = arith.constant 0 : i32
    %c0_i32_0 = arith.constant 0 : i32
    %c0_i32_1 = arith.constant 0 : i32
    return %c0_i32, %c0_i32_0 : i32, i32
  }
  func.func @transform_2(%arg0: i32) -> (i32, i32, i32) {
    %c0_i32 = arith.constant 0 : i32
    %c0_i32_0 = arith.constant 0 : i32
    %c0_i32_1 = arith.constant 0 : i32
    %c0_i32_2 = arith.constant 0 : i32
    return %c0_i32, %c0_i32_0, %c0_i32_1 : i32, i32, i32
  }
  func.func @transform_3(%arg0: i32) -> (i32, i32) {
    %c0_i32 = arith.constant 0 : i32
    %c0_i32_0 = arith.constant 0 : i32
    %c0_i32_1 = arith.constant 0 : i32
    return %c0_i32, %c0_i32_0 : i32, i32
  }
  func.func @transform_4(%arg0: i32) -> (i32, i32) {
    %c0_i32 = arith.constant 0 : i32
    %c0_i32_0 = arith.constant 0 : i32
    return %arg0, %c0_i32 : i32, i32
  }
}

</mosaic_0001>

<bundles_post_ra>
// kernel: tpu_custom_call.1
= control target key start
LH: loop header
LB: loop body
LE: loop exit
PB: predicated region body
PF: predicated region fallthrough
CT: control target
= control target key end

     0   :  { %9 = vsyncpa [#allocation3], 0  ;;  %s832_s0 = inlined_call_operand.hbm [shape: f32[8,26], index: 0, kind: input, shape index: {}]   ;;  %s833_s1 = inlined_call_operand.hbm [shape: f32[26,128], index: 1, kind: input, shape index: {}]   ;;  %s834_s2 = inlined_call_operand.hbm [shape: bf16[4,128,128], index: 2, kind: input, shape index: {}]   ;;  %s835_s3 = inlined_call_operand.hbm [shape: f32[8,128], index: 3, kind: input, shape index: {}]   ;;  %s836_s4 = inlined_call_operand.vmem [shape: f32[8,1], index: 4, kind: output, shape index: {}]  }
   0x1   :  { %10 = vsyncpa [#allocation5], 0  ;;  %s27_s17 = sshll.u32 %s833_s1, 4  ;;  %s28_s17 = int_to_ptr.hbm [resolvable:$true] %s27_s17 }
   0x2   :  { %11 = vsyncpa [#allocation8], 0  ;;  %s784_s18 = smov [#allocation4]   ;;  %s17_s22 = sshll.u32 %s832_s0, 4  ;;  %s18_s22 = int_to_ptr.hbm [resolvable:$true] %s17_s22 }
   0x3   :  { %s29_s19 = sshll.u32 %s784_s18, 4  ;;  %s785_s23 = smov 128   ;;  %s30_s19 = int_to_ptr.vmem [resolvable:$true] %s29_s19 }
   0x4   :  { %s786_s24 = smov 8   ;;  %s787_s25 = smov [#allocation2]  }
   0x5   :  { %35 = dma.hbm_to_vmem [thread:$0]  %s28_s17, 512, %s30_s19, [#allocation5], %s785_s23, %s785_s23, %s786_s24  }
   0x6   :  { %s19_s26 = sshll.u32 %s787_s25, 4  ;;  %s40_s29 = sshll.u32 %s834_s2, 4  ;;  %s20_s26 = int_to_ptr.vmem [resolvable:$true] %s19_s26  ;;  %s41_s29 = int_to_ptr.hbm [resolvable:$true] %s40_s29 }
   0x7   :  { %22 = dma.hbm_to_vmem [thread:$0]  %s18_s22, 128, %s20_s26, [#allocation3]  }
   0x8   :  { %s788_s1 = smov [#allocation6]   ;;  %s54_s0 = sshll.u32 %s835_s3, 4  ;;  %s55_s0 = int_to_ptr.hbm [resolvable:$true] %s54_s0 }
   0x9   :  { %s42_s30 = sshll.u32 %s788_s1, 4  ;;  %s789_s7 = smov 64   ;;  %s43_s30 = int_to_ptr.vmem [resolvable:$true] %s42_s30 }
   0xa   :  { %s790_s8 = smov 4   ;;  %s791_s9 = smov [#allocation7]  }
   0xb   :  { %48 = dma.hbm_to_vmem [thread:$0]  %s41_s29, 4096, %s43_s30, [#allocation5], %s789_s7, %s789_s7, %s790_s8  }
   0xc   :  { %s56_s10 = sshll.u32 %s791_s9, 4  ;;  %s57_s10 = int_to_ptr.vmem [resolvable:$true] %s56_s10 }
   0xd   :  { %59 = dma.hbm_to_vmem [thread:$0]  %s55_s0, 128, %s57_s10, [#allocation8]  }
   0xe   :  { %778 = dma.done.wait [#allocation3], 128  }
   0xf   :  { %779 = vsyncadd [#allocation3], 4294967168 }
  0x10   :  { %780 = dma.done.wait [#allocation5], 4608  }
  0x11   :  { %781 = vsyncadd [#allocation5], 4294962688 }
  0x12   :  { %782 = dma.done.wait [#allocation8], 128  }
  0x13   :  { %783 = vsyncadd [#allocation8], 4294967168  ;;  %vm87_vm0 = vcmask 1041408   ;;  %v80_v0 = vld [vmem:[#allocation4 + $0x18] sm:$0x3]  ;;  %v79_v1 = vld [vmem:[#allocation4 + $0x10] sm:$0xff] }
  0x14   :  { %489 = vmatpush.msk.msra.mxu0 %vm87_vm0, %v80_v0  ;;  %v78_v2 = vld [vmem:[#allocation4 + $0x8] sm:$0xff]  ;;  %v77_v3 = vld [vmem:[#allocation4] sm:$0xff]  ;;  %v76_v4 = vld [vmem:[#allocation2] sm:$0xff]  ;;  %vm83_vm1 = vcmask 211968   ;;  %vm480_vm2 = vcmask 7168  }
  0x15   :  { %v626_v5 = vld [vmem:[#allocation6 + $0x38] sm:$0xff]  ;;  %v625_v6 = vld [vmem:[#allocation6 + $0x30] sm:$0xff]  ;;  %v624_v7 = vld [vmem:[#allocation6 + $0x28] sm:$0xff] }
  0x16   :  { %104 = vmatpush.msra.mxu0 %v79_v1  ;;  %187 = vmatpush.bf16.msra.mxu1 %v626_v5  ;;  %v623_v8 = vld [vmem:[#allocation6 + $0x20] sm:$0xff]  ;;  %v622_v9 = vld [vmem:[#allocation6 + $0x18] sm:$0xff]  ;;  %v621_v10 = vld [vmem:[#allocation6 + $0x10] sm:$0xff] }
  0x17   :  { %v620_v11 = vld [vmem:[#allocation6 + $0x8] sm:$0xff]  ;;  %v619_v12 = vld [vmem:[#allocation6] sm:$0xff]  ;;  %v634_v14 = vld [vmem:[#allocation6 + $0x78] sm:$0xff] }
  0x18   :  { %105 = vmatpush.msra.mxu0 %v78_v2  ;;  %v659_v13 = vld [vmem:[#allocation7] ss:$0 sm:$0xff]  ;;  %269 = vmatpush.bf16.msra.mxu2 %v634_v14  ;;  %v633_v17 = vld [vmem:[#allocation6 + $0x70] sm:$0xff]  ;;  %v632_v20 = vld [vmem:[#allocation6 + $0x68] sm:$0xff] }
  0x19   :  { %v631_v21 = vld [vmem:[#allocation6 + $0x60] sm:$0xff]  ;;  %v630_v23 = vld [vmem:[#allocation6 + $0x58] sm:$0xff]  ;;  %v629_v26 = vld [vmem:[#allocation6 + $0x50] sm:$0xff] }
  0x1a   :  { %106 = vmatpush.msra.mxu0 %v77_v3  ;;  %188 = vmatpush.bf16.msra.mxu1 %v625_v6  ;;  %v628_v32 = vld [vmem:[#allocation6 + $0x48] sm:$0xff]  ;;  %v627_v33 = vld [vmem:[#allocation6 + $0x40] sm:$0xff]  ;;  %v642_v34 = vld [vmem:[#allocation6 + $0xb8] sm:$0xff] }
  0x1b   :  { %490 = vmatmul.msk.f32.vlgmr.msra.gmra.mxu0 %vm83_vm1, %v76_v4  ;;  %351 = vmatpush.bf16.msra.mxu3 %v642_v34  ;;  %v641_v35 = vld [vmem:[#allocation6 + $0xb0] sm:$0xff]  ;;  %v640_v36 = vld [vmem:[#allocation6 + $0xa8] sm:$0xff]  ;;  %v639_v37 = vld [vmem:[#allocation6 + $0xa0] sm:$0xff] }
  0x1c   :  { %270 = vmatpush.bf16.msra.mxu2 %v633_v17  ;;  %v638_v38 = vld [vmem:[#allocation6 + $0x98] sm:$0xff]  ;;  %v637_v39 = vld [vmem:[#allocation6 + $0x90] sm:$0xff]  ;;  %v660_v40 = vld [vmem:[#allocation7 + $0x1] ss:$0 sm:$0xff] }
  0x1d   :  { %v636_v46 = vld [vmem:[#allocation6 + $0x88] sm:$0xff]  ;;  %v635_v47 = vld [vmem:[#allocation6 + $0x80] sm:$0xff]  ;;  %v650_v54 = vld [vmem:[#allocation6 + $0xf8] sm:$0xff] }
  0x1e   :  { %189 = vmatpush.bf16.msra.mxu1 %v624_v7  ;;  %v661_v48 = vld [vmem:[#allocation7 + $0x2] ss:$0 sm:$0xff]  ;;  %441 = vmatpush.bf16.msrb.mxu0 %v650_v54  ;;  %v649_v55 = vld [vmem:[#allocation6 + $0xf0] sm:$0xff]  ;;  %v648_v56 = vld [vmem:[#allocation6 + $0xe8] sm:$0xff] }
  0x1f   :  { %352 = vmatpush.bf16.msra.mxu3 %v641_v35  ;;  %v647_v57 = vld [vmem:[#allocation6 + $0xe0] sm:$0xff]  ;;  %v646_v58 = vld [vmem:[#allocation6 + $0xd8] sm:$0xff]  ;;  %v645_v59 = vld [vmem:[#allocation6 + $0xd0] sm:$0xff] }
  0x20   :  { %271 = vmatpush.bf16.msra.mxu2 %v632_v20  ;;  %v644_v60 = vld [vmem:[#allocation6 + $0xc8] sm:$0xff]  ;;  %v643_v61 = vld [vmem:[#allocation6 + $0xc0] sm:$0xff] }
  0x21   :  { %v662_v62 = vld [vmem:[#allocation7 + $0x3] ss:$0 sm:$0xff] }
  0x22   :  { %190 = vmatpush.bf16.msra.mxu1 %v623_v8  ;;  %442 = vmatpush.bf16.msrb.mxu0 %v649_v55 }
  0x23   :  { %353 = vmatpush.bf16.msra.mxu3 %v640_v36 }
  0x24   :  { %272 = vmatpush.bf16.msra.mxu2 %v631_v21 }
  0x26   :  { %191 = vmatpush.bf16.msra.mxu1 %v622_v9  ;;  %443 = vmatpush.bf16.msrb.mxu0 %v648_v56 }
  0x27   :  { %354 = vmatpush.bf16.msra.mxu3 %v639_v37 }
  0x28   :  { %273 = vmatpush.bf16.msra.mxu2 %v630_v23  ;;  %v664_v23 = vld [vmem:[#allocation7 + $0x6] ss:$0 sm:$0xff] }
  0x2a   :  { %192 = vmatpush.bf16.msra.mxu1 %v621_v10  ;;  %444 = vmatpush.bf16.msrb.mxu0 %v647_v57 }
  0x2b   :  { %355 = vmatpush.bf16.msra.mxu3 %v638_v38 }
  0x2c   :  { %274 = vmatpush.bf16.msra.mxu2 %v629_v26 }
  0x2e   :  { %193 = vmatpush.bf16.msra.mxu1 %v620_v11  ;;  %445 = vmatpush.bf16.msrb.mxu0 %v646_v58 }
  0x2f   :  { %356 = vmatpush.bf16.msra.mxu3 %v637_v39 }
  0x30   :  { %275 = vmatpush.bf16.msra.mxu2 %v628_v32 }
  0x32   :  { %194 = vmatpush.bf16.msra.mxu1 %v619_v12  ;;  %446 = vmatpush.bf16.msrb.mxu0 %v645_v59  ;;  %v663_v12 = vld [vmem:[#allocation7 + $0x4] ss:$0 sm:$0xff] }
  0x33   :  { %357 = vmatpush.bf16.msra.mxu3 %v636_v46 }
  0x34   :  { %276 = vmatpush.bf16.msra.mxu2 %v627_v33 }
  0x36   :  { %447 = vmatpush.bf16.msrb.mxu0 %v644_v60 }
  0x37   :  { %358 = vmatpush.bf16.msra.mxu3 %v635_v47 }
  0x3a   :  { %448 = vmatpush.bf16.msrb.mxu0 %v643_v61 }
  0x98   :  { %v108_v15 = vpop.f32.mrf.mxu0 }
  0x99   :  { %v109_v16 = vadd.f32 %v659_v13, %v108_v15 }
  0x9b   :  { %v111_v18 = vmin.f32 %v109_v16, 20.0 }
  0x9d   :  { %v112_v19 = vmul.f32 1.442695, %v111_v18 }
  0x9f   :  { %666 = vpow2.f32 %v112_v19 }
  0xa5   :  { %v667_v22 = vpop.eup %666 }
  0xa6   :  { %v114_v24 = vadd.f32 2.0, %v667_v22 }
  0xa8   :  { %v115_v25 = vmul.f32 %v667_v22, %v114_v24 }
  0xaa   :  { %v117_v27 = vadd.f32 2.0, %v115_v25  ;;  %v116_v28 = vmul.f32 %v115_v25, %v109_v16 }
  0xac   :  { %668 = vrcp.f32 %v117_v27  ;;  %v665_v27 = vld [vmem:[#allocation7 + $0x5] ss:$0 sm:$0xff] }
  0xb2   :  { %v669_v29 = vpop.eup %668 }
  0xb3   :  { %v119_v30 = vmul.f32 %v669_v29, %v116_v28 }
  0xb5   :  { %v120_v31 = vpack.c.bf16 %v119_v30, %v119_v30 }
  0xb7   :  { %195 = vmatmul.bf16.vlgmr.msra.gmra.mxu1 %v120_v31 }
 0x134   :  { %v196_v41 = vpop.f32.mrf.mxu1 }
 0x135   :  { %v197_v42 = vadd.f32 %v660_v40, %v196_v41 }
 0x137   :  { %v200_v43 = vmax.f32 %v197_v42, 0.0 }
 0x139   :  { %v201_v44 = vpack.c.bf16 %v200_v43, %v200_v43 }
 0x13b   :  { %277 = vmatmul.bf16.vlgmr.msra.gmra.mxu2 %v201_v44 }
 0x13c   :  { %v198_v45 = vpop.f32.mrf.mxu1 }
 0x1be   :  { %v278_v49 = vpop.f32.mrf.mxu2 }
 0x1bf   :  { %v279_v50 = vadd.f32 %v661_v48, %v278_v49 }
 0x1c1   :  { %v282_v51 = vmax.f32 %v279_v50, 0.0 }
 0x1c3   :  { %v283_v52 = vpack.c.bf16 %v282_v51, %v282_v51 }
 0x1c5   :  { %359 = vmatmul.bf16.vlgmr.msra.gmra.mxu3 %v283_v52 }
 0x1c6   :  { %v280_v53 = vpop.f32.mrf.mxu2 }
 0x248   :  { %v360_v63 = vpop.f32.mrf.mxu3 }
 0x249   :  { %v361_v0 = vadd.f32 %v662_v62, %v360_v63 }
 0x24b   :  { %v364_v1 = vmin.f32 %v361_v0, 20.0 }
 0x24d   :  { %v365_v2 = vmul.f32 1.442695, %v364_v1 }
 0x24f   :  { %670 = vpow2.f32 %v365_v2 }
 0x250   :  { %v362_v3 = vpop.f32.mrf.mxu3 }
 0x255   :  { %v671_v4 = vpop.eup %670 }
 0x256   :  { %v367_v5 = vadd.f32 2.0, %v671_v4 }
 0x258   :  { %v368_v6 = vmul.f32 %v671_v4, %v367_v5 }
 0x25a   :  { %v370_v7 = vadd.f32 2.0, %v368_v6  ;;  %v369_v8 = vmul.f32 %v368_v6, %v361_v0 }
 0x25c   :  { %672 = vrcp.f32 %v370_v7 }
 0x262   :  { %v673_v9 = vpop.eup %672 }
 0x263   :  { %v372_v10 = vmul.f32 %v673_v9, %v369_v8 }
 0x265   :  { %v373_v11 = vpack.c.bf16 %v372_v10, %v372_v10 }
 0x267   :  { %449 = vmatmul.bf16.vlgmr.msrb.gmra.mxu0 %v373_v11 }
 0x2e4   :  { %v450_v13 = vpop.f32.mrf.mxu0 }
 0x2e5   :  { %v451_v14 = vadd.f32 %v663_v12, %v450_v13 }
 0x2e7   :  { %v454_v15 = vmin.f32 %v451_v14, 20.0 }
 0x2e9   :  { %v455_v16 = vmul.f32 1.442695, %v454_v15 }
 0x2eb   :  { %674 = vpow2.f32 %v455_v16 }
 0x2ec   :  { %v452_v17 = vpop.f32.mrf.mxu0 }
 0x2f1   :  { %v675_v18 = vpop.eup %674 }
 0x2f2   :  { %v457_v19 = vadd.f32 2.0, %v675_v18 }
 0x2f4   :  { %v458_v20 = vmul.f32 %v675_v18, %v457_v19 }
 0x2f6   :  { %v460_v21 = vadd.f32 2.0, %v458_v20  ;;  %v459_v22 = vmul.f32 %v458_v20, %v451_v14 }
 0x2f8   :  { %676 = vrcp.f32 %v460_v21 }
 0x2fe   :  { %v677_v24 = vpop.eup %676 }
 0x2ff   :  { %v462_v25 = vmul.f32 %v677_v24, %v459_v22 }
 0x301   :  { %v465_v26 = vmul.f32 %v664_v23, %v462_v25 }
 0x303   :  { %466 = vadd.xlane.f32.xlu0 %v465_v26 }
 0x376   :  { %v467_v28 = vpop.xlane.xlu0 %466 }
 0x377   :  { %v470_v29 = vadd.f32 %v665_v27, %v467_v28 }
 0x379   :  { %v471_v30 = vand.u32 2147483647, %v470_v29  ;;  %vm477_vm3 = vcmp.ge.f32.partialorder %v470_v29, 0.0 }
 0x37b   :  { %v472_v31 = vsub.f32 0.0, %v471_v30 }
 0x37d   :  { %v473_v32 = vmul.f32 1.442695, %v472_v31 }
 0x37f   :  { %678 = vpow2.f32 %v473_v32 }
 0x385   :  { %v679_v33 = vpop.eup %678 }
 0x386   :  { %v475_v34 = vadd.f32 1.0, %v679_v33 }
 0x388   :  { %680 = vrcp.f32 %v475_v34 }
 0x38e   :  { %v681_v35 = vpop.eup %680 }
 0x38f   :  { %v478_v36 = vmul.f32 %v681_v35, %v679_v33 }
 0x391   :  { %v479_v37 = vsel %vm477_vm3, %v681_v35, %v478_v36 }
 0x392   :  { %481 = vst.msk [vmem:[%s836_s4] sm:$0xff] %vm480_vm2, %v479_v37 }
 0x393   :  { %486 = vsyncpa [#allocation3], 1 }
 0x394   :  { %487 = vsyncpa [#allocation5], 1 }
 0x395   :  { %488 = vsyncpa [#allocation8], 1 }

</bundles_post_ra>
